<compile_context>
chip_gen: v5e
topology: v5e:2x2
jax: 0.10.0
libtpu: 0.0.40
codegen_flags: <defaults>
</compile_context>

<pallas_src>
import math
import functools

import jax
import jax.numpy as jnp
from jax.experimental import pallas as pl
from jax.experimental.pallas import tpu as pltpu

LANE = 128          # TPU lane width: pad every feature axis to this
NUM_CLASSES = 10    # digits 0..9 (nn.Embedding(10, embed_size))
HIDDEN = 50         # nn.Linear(embed_size, 50)
OUT = 10            # nn.Linear(50, 10)


def _round_up(x, m):
    return ((x + m - 1) // m) * m


def digit_sum_phi_kernel(idx_ref, emb_ref, w1_ref, b1_ref, w2_ref, b2_ref, o_ref):
    """One row-tile of relu(relu(one_hot(idx) @ E @ W1 + b1) @ W2 + b2)."""
    tb = idx_ref.shape[0]
    c_pad = emb_ref.shape[0]

    idx = idx_ref[...]                                              # (TB, 1) int32
    classes = jax.lax.broadcasted_iota(jnp.int32, (tb, c_pad), 1)   # (TB, 128)
    onehot = (classes == idx).astype(jnp.float32)                   # (TB, 128)

    # Embedding lookup as a lane-dense MXU matmul.
    e = jnp.dot(onehot, emb_ref[...], preferred_element_type=jnp.float32)
    # Linear(embed, 50) + ReLU (hidden padded to 128; pad lanes stay exactly 0).
    h = jnp.dot(e, w1_ref[...], preferred_element_type=jnp.float32) + b1_ref[...]
    h = jnp.maximum(h, 0.0)
    # Linear(50, 10) + ReLU (output padded to 128 lanes -> unmasked stores).
    out = jnp.dot(h, w2_ref[...], preferred_element_type=jnp.float32) + b2_ref[...]
    out = jnp.maximum(out, 0.0)
    o_ref[...] = out.astype(o_ref.dtype)


@functools.partial(jax.jit, static_argnames=("block_rows",))
def digit_sum_phi(x_idx, emb_p, w1_p, b1_p, w2_p, b2_p, *, block_rows=512):
    """x_idx: int array of digits 0..9, any shape. Returns x_idx.shape + (10,)."""
    orig_shape = x_idx.shape
    n = math.prod(orig_shape) if orig_shape else 1

    c_pad, e_pad = emb_p.shape
    h_pad = w1_p.shape[1]
    o_pad = w2_p.shape[1]

    # Row-tile the flattened batch; keep tiles large to amortize per-step cost.
    tb = min(block_rows, _round_up(n, 8))
    grid_n = pl.cdiv(n, tb)
    n_pad = grid_n * tb

    idx = jnp.zeros((n_pad, 1), jnp.int32).at[:n, 0].set(
        x_idx.reshape(-1).astype(jnp.int32))

    flops = 2 * n_pad * (c_pad * e_pad + e_pad * h_pad + h_pad * o_pad)
    bytes_accessed = 4 * (n_pad * (1 + o_pad)
                          + c_pad * e_pad + e_pad * h_pad + h_pad
                          + h_pad * o_pad + o_pad)

    resident = lambda i: (0, 0)
    out_p = pl.pallas_call(
        digit_sum_phi_kernel,
        out_shape=jax.ShapeDtypeStruct((n_pad, o_pad), jnp.float32),
        grid_spec=pltpu.PrefetchScalarGridSpec(
            num_scalar_prefetch=0,
            grid=(grid_n,),
            in_specs=[
                pl.BlockSpec((tb, 1), lambda i: (i, 0)),       # digit indices
                pl.BlockSpec((c_pad, e_pad), resident),        # embedding table
                pl.BlockSpec((e_pad, h_pad), resident),        # W1
                pl.BlockSpec((1, h_pad), resident),            # b1
                pl.BlockSpec((h_pad, o_pad), resident),        # W2
                pl.BlockSpec((1, o_pad), resident),            # b2
            ],
            out_specs=pl.BlockSpec((tb, o_pad), lambda i: (i, 0)),
        ),
        compiler_params=pltpu.CompilerParams(
            dimension_semantics=("parallel",)),
        cost_estimate=pl.CostEstimate(
            flops=flops, transcendentals=0, bytes_accessed=bytes_accessed),
    )(idx, emb_p, w1_p, b1_p, w2_p, b2_p)

    out = out_p[:n, :OUT]
    return out.reshape(orig_shape + (OUT,))


def init_params(key, embed_size):
    """Deterministic init mimicking nn.Embedding (N(0,1)) and nn.Linear
    (uniform(-1/sqrt(fan_in), +1/sqrt(fan_in)))."""
    k1, k2, k3, k4, k5 = jax.random.split(key, 5)
    emb = jax.random.normal(k1, (NUM_CLASSES, embed_size), jnp.float32)
    bound1 = 1.0 / math.sqrt(embed_size)
    w1 = jax.random.uniform(k2, (embed_size, HIDDEN), jnp.float32, -bound1, bound1)
    b1 = jax.random.uniform(k3, (HIDDEN,), jnp.float32, -bound1, bound1)
    bound2 = 1.0 / math.sqrt(HIDDEN)
    w2 = jax.random.uniform(k4, (HIDDEN, OUT), jnp.float32, -bound2, bound2)
    b2 = jax.random.uniform(k5, (OUT,), jnp.float32, -bound2, bound2)
    return emb, w1, b1, w2, b2


def prepare_params(emb, w1, b1, w2, b2):
    """Zero-pad all feature axes to 128 lanes once (numerically exact)."""
    embed_size = emb.shape[1]
    c_pad = _round_up(NUM_CLASSES, LANE)
    e_pad = _round_up(embed_size, LANE)
    h_pad = _round_up(HIDDEN, LANE)
    o_pad = _round_up(OUT, LANE)
    emb_p = jnp.zeros((c_pad, e_pad), jnp.float32).at[:NUM_CLASSES, :embed_size].set(emb)
    w1_p = jnp.zeros((e_pad, h_pad), jnp.float32).at[:embed_size, :HIDDEN].set(w1)
    b1_p = jnp.zeros((1, h_pad), jnp.float32).at[0, :HIDDEN].set(b1)
    w2_p = jnp.zeros((h_pad, o_pad), jnp.float32).at[:HIDDEN, :OUT].set(w2)
    b2_p = jnp.zeros((1, o_pad), jnp.float32).at[0, :OUT].set(b2)
    return emb_p, w1_p, b1_p, w2_p, b2_p


if __name__ == "__main__":
    key = jax.random.PRNGKey(0)
    kx, kp = jax.random.split(key)

    embed_size = 32
    batch, seq = 4, 8   # 4 examples of 8 digits each

    x = jax.random.randint(kx, (batch, seq), 0, NUM_CLASSES, dtype=jnp.int32)
    emb, w1, b1, w2, b2 = init_params(kp, embed_size)
    emb_p, w1_p, b1_p, w2_p, b2_p = prepare_params(emb, w1, b1, w2, b2)

    out = digit_sum_phi(x, emb_p, w1_p, b1_p, w2_p, b2_p)
    out = jax.block_until_ready(out)

    # Pure-JAX reference: Embedding -> Linear -> ReLU -> Linear -> ReLU
    e_ref = emb[x]
    h_ref = jnp.maximum(e_ref @ w1 + b1, 0.0)
    ref = jnp.maximum(h_ref @ w2 + b2, 0.0)

    assert out.shape == (batch, seq, OUT)
    assert jnp.allclose(out, ref, atol=1e-5, rtol=1e-5)

    print("KERNEL_OK")
</pallas_src>

<mosaic_0001>
module attributes {stable_mosaic.version = 11 : i64} {
  func.func @digit_sum_phi_kernel(%arg0: i32, %arg1: memref<32x1xi32, #tpu.memory_space<vmem>>, %arg2: memref<128x128xf32, #tpu.memory_space<vmem>>, %arg3: memref<128x128xf32, #tpu.memory_space<vmem>>, %arg4: memref<1x128xf32, #tpu.memory_space<vmem>>, %arg5: memref<128x128xf32, #tpu.memory_space<vmem>>, %arg6: memref<1x128xf32, #tpu.memory_space<vmem>>, %arg7: memref<32x128xf32, #tpu.memory_space<vmem>>) attributes {dimension_semantics = [#tpu.dimension_semantics<parallel>], iteration_bounds = array<i64: 1>, scalar_prefetch = 0 : i64, scratch_operands = 0 : i64, tpu.core_type = #tpu.core_type<tc>, window_params = [{transform_indices = @transform_0, window_bounds = array<i64: 32, 1>}, {pipeline_mode = #tpu.pipeline_mode<synchronous>, transform_indices = @transform_1, window_bounds = array<i64: 128, 128>}, {pipeline_mode = #tpu.pipeline_mode<synchronous>, transform_indices = @transform_2, window_bounds = array<i64: 128, 128>}, {pipeline_mode = #tpu.pipeline_mode<synchronous>, transform_indices = @transform_3, window_bounds = array<i64: 1, 128>}, {pipeline_mode = #tpu.pipeline_mode<synchronous>, transform_indices = @transform_4, window_bounds = array<i64: 128, 128>}, {pipeline_mode = #tpu.pipeline_mode<synchronous>, transform_indices = @transform_5, window_bounds = array<i64: 1, 128>}, {transform_indices = @transform_6, window_bounds = array<i64: 32, 128>}]} {
    %c0 = arith.constant 0 : index
    %c0_0 = arith.constant 0 : index
    %0 = vector.load %arg1[%c0, %c0_0] : memref<32x1xi32, #tpu.memory_space<vmem>>, vector<32x1xi32>
    %1 = tpu.iota {dimensions = array<i32: 1>} : vector<32x128xi32>
    %2 = vector.broadcast %0 : vector<32x1xi32> to vector<32x128xi32>
    %3 = arith.cmpi eq, %1, %2 : vector<32x128xi32>
    %4 = arith.extui %3 : vector<32x128xi1> to vector<32x128xi32>
    %5 = arith.sitofp %4 : vector<32x128xi32> to vector<32x128xf32>
    %c0_1 = arith.constant 0 : index
    %c0_2 = arith.constant 0 : index
    %6 = vector.load %arg2[%c0_1, %c0_2] : memref<128x128xf32, #tpu.memory_space<vmem>>, vector<128x128xf32>
    %cst = arith.constant dense<0.000000e+00> : vector<32x128xf32>
    %7 = tpu.matmul %5, %6, %cst {dimension_numbers = #tpu.dot_dimension_numbers<[1], [0], [0], [1], [0, 0, 1, 1], [], []>} : vector<32x128xf32>, vector<128x128xf32>, vector<32x128xf32> -> vector<32x128xf32>
    %c0_3 = arith.constant 0 : index
    %c0_4 = arith.constant 0 : index
    %8 = vector.load %arg3[%c0_3, %c0_4] : memref<128x128xf32, #tpu.memory_space<vmem>>, vector<128x128xf32>
    %cst_5 = arith.constant dense<0.000000e+00> : vector<32x128xf32>
    %9 = tpu.matmul %7, %8, %cst_5 {dimension_numbers = #tpu.dot_dimension_numbers<[1], [0], [0], [1], [0, 0, 1, 1], [], []>} : vector<32x128xf32>, vector<128x128xf32>, vector<32x128xf32> -> vector<32x128xf32>
    %c0_6 = arith.constant 0 : index
    %c0_7 = arith.constant 0 : index
    %10 = vector.load %arg4[%c0_6, %c0_7] : memref<1x128xf32, #tpu.memory_space<vmem>>, vector<1x128xf32>
    %11 = vector.broadcast %10 : vector<1x128xf32> to vector<32x128xf32>
    %12 = arith.addf %9, %11 : vector<32x128xf32>
    %cst_8 = arith.constant 0.000000e+00 : f32
    %13 = vector.broadcast %cst_8 : f32 to vector<32x128xf32>
    %14 = arith.maximumf %12, %13 : vector<32x128xf32>
    %c0_9 = arith.constant 0 : index
    %c0_10 = arith.constant 0 : index
    %15 = vector.load %arg5[%c0_9, %c0_10] : memref<128x128xf32, #tpu.memory_space<vmem>>, vector<128x128xf32>
    %cst_11 = arith.constant dense<0.000000e+00> : vector<32x128xf32>
    %16 = tpu.matmul %14, %15, %cst_11 {dimension_numbers = #tpu.dot_dimension_numbers<[1], [0], [0], [1], [0, 0, 1, 1], [], []>} : vector<32x128xf32>, vector<128x128xf32>, vector<32x128xf32> -> vector<32x128xf32>
    %c0_12 = arith.constant 0 : index
    %c0_13 = arith.constant 0 : index
    %17 = vector.load %arg6[%c0_12, %c0_13] : memref<1x128xf32, #tpu.memory_space<vmem>>, vector<1x128xf32>
    %18 = vector.broadcast %17 : vector<1x128xf32> to vector<32x128xf32>
    %19 = arith.addf %16, %18 : vector<32x128xf32>
    %cst_14 = arith.constant 0.000000e+00 : f32
    %20 = vector.broadcast %cst_14 : f32 to vector<32x128xf32>
    %21 = arith.maximumf %19, %20 : vector<32x128xf32>
    %c0_15 = arith.constant 0 : index
    %c0_16 = arith.constant 0 : index
    %22 = vector.load %arg7[%c0_15, %c0_16] : memref<32x128xf32, #tpu.memory_space<vmem>>, vector<32x128xf32>
    tpu.vector_store %arg7[%c0_15, %c0_16], %21 {strides = array<i32>} : memref<32x128xf32, #tpu.memory_space<vmem>>, vector<32x128xf32>,
    return
  }
  func.func @transform_0(%arg0: i32) -> (i32, i32) {
    %c0_i32 = arith.constant 0 : i32
    %c0_i32_0 = arith.constant 0 : i32
    return %arg0, %c0_i32 : i32, i32
  }
  func.func @transform_1(%arg0: i32) -> (i32, i32) {
    %c0_i32 = arith.constant 0 : i32
    %c0_i32_0 = arith.constant 0 : i32
    %c0_i32_1 = arith.constant 0 : i32
    return %c0_i32, %c0_i32_0 : i32, i32
  }
  func.func @transform_2(%arg0: i32) -> (i32, i32) {
    %c0_i32 = arith.constant 0 : i32
    %c0_i32_0 = arith.constant 0 : i32
    %c0_i32_1 = arith.constant 0 : i32
    return %c0_i32, %c0_i32_0 : i32, i32
  }
  func.func @transform_3(%arg0: i32) -> (i32, i32) {
    %c0_i32 = arith.constant 0 : i32
    %c0_i32_0 = arith.constant 0 : i32
    %c0_i32_1 = arith.constant 0 : i32
    return %c0_i32, %c0_i32_0 : i32, i32
  }
  func.func @transform_4(%arg0: i32) -> (i32, i32) {
    %c0_i32 = arith.constant 0 : i32
    %c0_i32_0 = arith.constant 0 : i32
    %c0_i32_1 = arith.constant 0 : i32
    return %c0_i32, %c0_i32_0 : i32, i32
  }
  func.func @transform_5(%arg0: i32) -> (i32, i32) {
    %c0_i32 = arith.constant 0 : i32
    %c0_i32_0 = arith.constant 0 : i32
    %c0_i32_1 = arith.constant 0 : i32
    return %c0_i32, %c0_i32_0 : i32, i32
  }
  func.func @transform_6(%arg0: i32) -> (i32, i32) {
    %c0_i32 = arith.constant 0 : i32
    %c0_i32_0 = arith.constant 0 : i32
    return %arg0, %c0_i32 : i32, i32
  }
}

</mosaic_0001>

<bundles_post_ra>
// kernel: digit_sum_phi.1
= control target key start
LH: loop header
LB: loop body
LE: loop exit
PB: predicated region body
PF: predicated region fallthrough
CT: control target
= control target key end

     0   :  { %11 = vsyncpa [#allocation3], 0  ;;  %s453_s0 = inlined_call_operand.vmem [shape: s32[32,1], index: 0, kind: input, shape index: {}]   ;;  %s454_s1 = inlined_call_operand.hbm [shape: f32[128,128], index: 1, kind: input, shape index: {}]   ;;  %s455_s2 = inlined_call_operand.hbm [shape: f32[128,128], index: 2, kind: input, shape index: {}]   ;;  %s456_s3 = inlined_call_operand.vmem [shape: f32[1,128], index: 3, kind: input, shape index: {}]   ;;  %s457_s4 = inlined_call_operand.hbm [shape: f32[128,128], index: 4, kind: input, shape index: {}]   ;;  %s458_s5 = inlined_call_operand.vmem [shape: f32[1,128], index: 5, kind: input, shape index: {}]   ;;  %s459_s6 = inlined_call_operand.vmem [shape: f32[32,128], index: 6, kind: output, shape index: {}]  }
   0x1   :  { %12 = vsyncpa [#allocation5], 0  ;;  %s32_s23 = sshll.u32 %s455_s2, 4  ;;  %s372_s24 = smov [#allocation4]   ;;  %s33_s23 = int_to_ptr.hbm [resolvable:$true] %s32_s23 }
   0x2   :  { %s34_s25 = sshll.u32 %s372_s24, 4  ;;  %s19_s28 = sshll.u32 %s454_s1, 4  ;;  %s35_s25 = int_to_ptr.vmem [resolvable:$true] %s34_s25  ;;  %s20_s28 = int_to_ptr.hbm [resolvable:$true] %s19_s28 }
   0x3   :  { %s373_s29 = smov 128   ;;  %s374_s30 = smov 8  }
   0x4   :  { %40 = dma.hbm_to_vmem [thread:$0]  %s33_s23, 2048, %s35_s25, [#allocation5], %s373_s29, %s373_s29, %s374_s30  }
   0x5   :  { %s375_s7 = smov [#allocation2]   ;;  %s47_s11 = sshll.u32 %s457_s4, 4  ;;  %s48_s11 = int_to_ptr.hbm [resolvable:$true] %s47_s11 }
   0x6   :  { %s21_s8 = sshll.u32 %s375_s7, 4  ;;  %s376_s2 = smov [#allocation6]   ;;  %s22_s8 = int_to_ptr.vmem [resolvable:$true] %s21_s8 }
   0x7   :  { %27 = dma.hbm_to_vmem [thread:$0]  %s20_s28, 2048, %s22_s8, [#allocation3], %s373_s29, %s373_s29, %s374_s30  }
   0x8   :  { %s49_s12 = sshll.u32 %s376_s2, 4  ;;  %s50_s12 = int_to_ptr.vmem [resolvable:$true] %s49_s12 }
   0x9   :  { %55 = dma.hbm_to_vmem [thread:$0]  %s48_s11, 2048, %s50_s12, [#allocation5], %s373_s29, %s373_s29, %s374_s30  }
   0xa   :  { %368 = dma.done.wait [#allocation3], 2048  }
   0xb   :  { %369 = vsyncadd [#allocation3], 4294965248 }
   0xc   :  { %370 = dma.done.wait [#allocation5], 4096  }
   0xd   :  { %371 = vsyncadd [#allocation5], 4294963200  ;;  %v377_v0 = vmov 0   ;;  %v70_v1 = vld [vmem:[%s453_s0] sm:$0xff]  ;;  %v72_v2 = vld [vmem:[%s453_s0 + $0x10] sm:$0xff]  ;;  %v74_v21 = vlaneseq  ;;  %v378_v29 = vmov 1.0  }
   0xe   :  { %292 = vset.pattern.permute.xlu0 %v377_v0  ;;  %293 = vset.pattern.permute.xlu1 %v377_v0  ;;  %v115_v3 = vld [vmem:[#allocation2 + $0x78] sm:$0xff]  ;;  %v114_v4 = vld [vmem:[#allocation2 + $0x70] sm:$0xff]  ;;  %v113_v5 = vld [vmem:[#allocation2 + $0x68] sm:$0xff] }
   0xf   :  { %77 = vperm.xlu0 %292, %v70_v1   ;;  %83 = vperm.xlu1 %293, %v72_v2   ;;  %v71_v6 = vld [vmem:[%s453_s0 + $0x8] sm:$0xff]  ;;  %v112_v7 = vld [vmem:[#allocation2 + $0x60] sm:$0xff]  ;;  %v73_v8 = vld [vmem:[%s453_s0 + $0x18] sm:$0xff]  ;;  %v75_v25 = vand.u32 127, %v74_v21 }
  0x10   :  { %116 = vmatpush.msra.mxu0 %v115_v3  ;;  %269 = vmatpush.msra.mxu3 %v115_v3  ;;  %v111_v9 = vld [vmem:[#allocation2 + $0x58] sm:$0xff]  ;;  %v110_v10 = vld [vmem:[#allocation2 + $0x50] sm:$0xff]  ;;  %v109_v11 = vld [vmem:[#allocation2 + $0x48] sm:$0xff] }
  0x11   :  { %v108_v12 = vld [vmem:[#allocation2 + $0x40] sm:$0xff]  ;;  %v107_v13 = vld [vmem:[#allocation2 + $0x38] sm:$0xff]  ;;  %v106_v14 = vld [vmem:[#allocation2 + $0x30] sm:$0xff] }
  0x12   :  { %117 = vmatpush.msra.mxu0 %v114_v4  ;;  %270 = vmatpush.msra.mxu3 %v114_v4  ;;  %v105_v15 = vld [vmem:[#allocation2 + $0x28] sm:$0xff]  ;;  %v104_v16 = vld [vmem:[#allocation2 + $0x20] sm:$0xff]  ;;  %v103_v17 = vld [vmem:[#allocation2 + $0x18] sm:$0xff] }
  0x13   :  { %v102_v18 = vld [vmem:[#allocation2 + $0x10] sm:$0xff]  ;;  %v101_v19 = vld [vmem:[#allocation2 + $0x8] sm:$0xff]  ;;  %v100_v20 = vld [vmem:[#allocation2] sm:$0xff] }
  0x14   :  { %118 = vmatpush.msra.mxu0 %v113_v5  ;;  %271 = vmatpush.msra.mxu3 %v113_v5  ;;  %v160_v22 = vld [vmem:[#allocation4 + $0x78] sm:$0xff]  ;;  %v159_v23 = vld [vmem:[#allocation4 + $0x70] sm:$0xff]  ;;  %v158_v24 = vld [vmem:[#allocation4 + $0x68] sm:$0xff] }
  0x15   :  { %165 = vmatpush.msra.mxu1 %v160_v22  ;;  %v157_v26 = vld [vmem:[#allocation4 + $0x60] sm:$0xff]  ;;  %v156_v28 = vld [vmem:[#allocation4 + $0x58] sm:$0xff]  ;;  %v155_v30 = vld [vmem:[#allocation4 + $0x50] sm:$0xff] }
  0x16   :  { %119 = vmatpush.msra.mxu0 %v112_v7  ;;  %272 = vmatpush.msra.mxu3 %v112_v7  ;;  %v154_v31 = vld [vmem:[#allocation4 + $0x48] sm:$0xff]  ;;  %v153_v32 = vld [vmem:[#allocation4 + $0x40] sm:$0xff]  ;;  %v152_v34 = vld [vmem:[#allocation4 + $0x38] sm:$0xff] }
  0x17   :  { %80 = vperm.xlu0 %292, %v71_v6   ;;  %86 = vperm.xlu1 %293, %v73_v8   ;;  %v151_v35 = vld [vmem:[#allocation4 + $0x30] sm:$0xff]  ;;  %v150_v37 = vld [vmem:[#allocation4 + $0x28] sm:$0xff]  ;;  %v149_v38 = vld [vmem:[#allocation4 + $0x20] sm:$0xff] }
  0x18   :  { %120 = vmatpush.msra.mxu0 %v111_v9  ;;  %273 = vmatpush.msra.mxu3 %v111_v9  ;;  %v148_v39 = vld [vmem:[#allocation4 + $0x18] sm:$0xff]  ;;  %v147_v40 = vld [vmem:[#allocation4 + $0x10] sm:$0xff]  ;;  %v146_v41 = vld [vmem:[#allocation4 + $0x8] sm:$0xff] }
  0x19   :  { %166 = vmatpush.msra.mxu1 %v159_v23  ;;  %v145_v43 = vld [vmem:[#allocation4] sm:$0xff]  ;;  %v213_v44 = vld [vmem:[#allocation6 + $0x78] sm:$0xff]  ;;  %v212_v45 = vld [vmem:[#allocation6 + $0x70] sm:$0xff] }
  0x1a   :  { %121 = vmatpush.msra.mxu0 %v110_v10  ;;  %274 = vmatpush.msra.mxu3 %v110_v10  ;;  %v211_v47 = vld [vmem:[#allocation6 + $0x68] sm:$0xff]  ;;  %v210_v48 = vld [vmem:[#allocation6 + $0x60] sm:$0xff]  ;;  %v209_v49 = vld [vmem:[#allocation6 + $0x58] sm:$0xff] }
  0x1b   :  { %167 = vmatpush.msra.mxu1 %v158_v24  ;;  %218 = vmatpush.msra.mxu2 %v213_v44  ;;  %v208_v50 = vld [vmem:[#allocation6 + $0x50] sm:$0xff]  ;;  %v207_v51 = vld [vmem:[#allocation6 + $0x48] sm:$0xff]  ;;  %v206_v52 = vld [vmem:[#allocation6 + $0x40] sm:$0xff] }
  0x1c   :  { %122 = vmatpush.msra.mxu0 %v109_v11  ;;  %275 = vmatpush.msra.mxu3 %v109_v11  ;;  %v205_v53 = vld [vmem:[#allocation6 + $0x38] sm:$0xff]  ;;  %v204_v55 = vld [vmem:[#allocation6 + $0x30] sm:$0xff]  ;;  %v203_v56 = vld [vmem:[#allocation6 + $0x28] sm:$0xff] }
  0x1d   :  { %168 = vmatpush.msra.mxu1 %v157_v26  ;;  %219 = vmatpush.msra.mxu2 %v212_v45  ;;  %v202_v57 = vld [vmem:[#allocation6 + $0x20] sm:$0xff]  ;;  %v201_v58 = vld [vmem:[#allocation6 + $0x18] sm:$0xff]  ;;  %v200_v61 = vld [vmem:[#allocation6 + $0x10] sm:$0xff] }
  0x1e   :  { %123 = vmatpush.msra.mxu0 %v108_v12  ;;  %276 = vmatpush.msra.mxu3 %v108_v12  ;;  %v199_v62 = vld [vmem:[#allocation6 + $0x8] sm:$0xff]  ;;  %v198_v63 = vld [vmem:[#allocation6] sm:$0xff] }
  0x1f   :  { %169 = vmatpush.msra.mxu1 %v156_v28  ;;  %220 = vmatpush.msra.mxu2 %v211_v47  ;;  %v294_v0 = vld [vmem:[%s456_s3] ss:$0 sm:$0xff] }
  0x20   :  { %124 = vmatpush.msra.mxu0 %v107_v13  ;;  %277 = vmatpush.msra.mxu3 %v107_v13  ;;  %v295_v13 = vld [vmem:[%s458_s5] ss:$0 sm:$0xff] }
  0x21   :  { %170 = vmatpush.msra.mxu1 %v155_v30  ;;  %221 = vmatpush.msra.mxu2 %v210_v48 }
  0x22   :  { %125 = vmatpush.msra.mxu0 %v106_v14  ;;  %278 = vmatpush.msra.mxu3 %v106_v14 }
  0x23   :  { %171 = vmatpush.msra.mxu1 %v154_v31  ;;  %222 = vmatpush.msra.mxu2 %v209_v49 }
  0x24   :  { %126 = vmatpush.msra.mxu0 %v105_v15  ;;  %279 = vmatpush.msra.mxu3 %v105_v15 }
  0x25   :  { %172 = vmatpush.msra.mxu1 %v153_v32  ;;  %223 = vmatpush.msra.mxu2 %v208_v50 }
  0x26   :  { %127 = vmatpush.msra.mxu0 %v104_v16  ;;  %280 = vmatpush.msra.mxu3 %v104_v16 }
  0x27   :  { %173 = vmatpush.msra.mxu1 %v152_v34  ;;  %224 = vmatpush.msra.mxu2 %v207_v51 }
  0x28   :  { %128 = vmatpush.msra.mxu0 %v103_v17  ;;  %281 = vmatpush.msra.mxu3 %v103_v17 }
  0x29   :  { %174 = vmatpush.msra.mxu1 %v151_v35  ;;  %225 = vmatpush.msra.mxu2 %v206_v52 }
  0x2a   :  { %129 = vmatpush.msra.mxu0 %v102_v18  ;;  %282 = vmatpush.msra.mxu3 %v102_v18 }
  0x2b   :  { %175 = vmatpush.msra.mxu1 %v150_v37  ;;  %226 = vmatpush.msra.mxu2 %v205_v53 }
  0x2c   :  { %130 = vmatpush.msra.mxu0 %v101_v19  ;;  %283 = vmatpush.msra.mxu3 %v101_v19 }
  0x2d   :  { %176 = vmatpush.msra.mxu1 %v149_v38  ;;  %227 = vmatpush.msra.mxu2 %v204_v55 }
  0x2e   :  { %131 = vmatpush.msra.mxu0 %v100_v20  ;;  %284 = vmatpush.msra.mxu3 %v100_v20 }
  0x2f   :  { %177 = vmatpush.msra.mxu1 %v148_v39  ;;  %228 = vmatpush.msra.mxu2 %v203_v56 }
  0x31   :  { %178 = vmatpush.msra.mxu1 %v147_v40  ;;  %229 = vmatpush.msra.mxu2 %v202_v57 }
  0x33   :  { %179 = vmatpush.msra.mxu1 %v146_v41  ;;  %230 = vmatpush.msra.mxu2 %v201_v58 }
  0x35   :  { %180 = vmatpush.msra.mxu1 %v145_v43  ;;  %231 = vmatpush.msra.mxu2 %v200_v61 }
  0x37   :  { %232 = vmatpush.msra.mxu2 %v199_v62 }
  0x39   :  { %233 = vmatpush.msra.mxu2 %v198_v63 }
  0x81   :  { %v78_v27 = vpop.permute.xlu0 %77  ;;  %v84_v36 = vpop.permute.xlu1 %83 }
  0x82   :  { %vm88_vm0 = vcmp.eq.s32.totalorder %v75_v25, %v78_v27  ;;  %vm90_vm2 = vcmp.eq.s32.totalorder %v75_v25, %v84_v36 }
  0x83   :  { %265 = vmatmul.msk.f32.vlgmr.msra.gmra.mxu0 %vm88_vm0, %v378_v29 }
  0x89   :  { %v81_v33 = vpop.permute.xlu0 %80  ;;  %v87_v42 = vpop.permute.xlu1 %86 }
  0x8a   :  { %vm89_vm1 = vcmp.eq.s32.totalorder %v75_v25, %v81_v33  ;;  %vm91_vm3 = vcmp.eq.s32.totalorder %v75_v25, %v87_v42 }
  0x8b   :  { %266 = vmatmul.msk.f32.vlgmr.msra.gmra.mxu3 %vm89_vm1, %v378_v29 }
  0x93   :  { %267 = vmatmul.msk.f32.gmra.mxu3 %vm90_vm2, %v378_v29 }
  0x9b   :  { %268 = vmatmul.msk.f32.gmra.mxu3 %vm91_vm3, %v378_v29 }
 0x100   :  { %v133_v46 = vpop.f32.mrf.mxu0 }
 0x101   :  { %181 = vmatmul.f32.vlgmr.msra.gmra.mxu1 %v133_v46 }
 0x10e   :  { %v136_v54 = vpop.f32.mrf.mxu3 }
 0x10f   :  { %184 = vmatmul.f32.gmra.mxu1 %v136_v54 }
 0x116   :  { %v139_v59 = vpop.f32.mrf.mxu3 }
 0x117   :  { %187 = vmatmul.f32.gmra.mxu1 %v139_v59 }
 0x11e   :  { %v142_v60 = vpop.f32.mrf.mxu3 }
 0x11f   :  { %190 = vmatmul.f32.gmra.mxu1 %v142_v60 }
 0x17e   :  { %v182_v1 = vpop.f32.mrf.mxu1 }
 0x17f   :  { %v183_v2 = vadd.f32 %v294_v0, %v182_v1 }
 0x181   :  { %v194_v3 = vmax.f32 %v183_v2, 0.0 }
 0x183   :  { %234 = vmatmul.f32.vlgmr.msra.gmra.mxu2 %v194_v3 }
 0x18c   :  { %v185_v4 = vpop.f32.mrf.mxu1 }
 0x18d   :  { %v186_v5 = vadd.f32 %v294_v0, %v185_v4 }
 0x18f   :  { %v195_v6 = vmax.f32 %v186_v5, 0.0 }
 0x191   :  { %237 = vmatmul.f32.gmra.mxu2 %v195_v6 }
 0x194   :  { %v188_v7 = vpop.f32.mrf.mxu1 }
 0x195   :  { %v189_v8 = vadd.f32 %v294_v0, %v188_v7 }
 0x197   :  { %v196_v9 = vmax.f32 %v189_v8, 0.0 }
 0x199   :  { %240 = vmatmul.f32.gmra.mxu2 %v196_v9 }
 0x19c   :  { %v191_v10 = vpop.f32.mrf.mxu1 }
 0x19d   :  { %v192_v11 = vadd.f32 %v294_v0, %v191_v10 }
 0x19f   :  { %v197_v12 = vmax.f32 %v192_v11, 0.0 }
 0x1a1   :  { %243 = vmatmul.f32.gmra.mxu2 %v197_v12 }
 0x206   :  { %v235_v14 = vpop.f32.mrf.mxu2 }
 0x207   :  { %v236_v15 = vadd.f32 %v295_v13, %v235_v14 }
 0x209   :  { %v247_v16 = vmax.f32 %v236_v15, 0.0 }
 0x20b   :  { %251 = vst [vmem:[%s459_s6] sm:$0xff] %v247_v16 }
 0x214   :  { %v238_v17 = vpop.f32.mrf.mxu2 }
 0x215   :  { %v239_v18 = vadd.f32 %v295_v13, %v238_v17 }
 0x217   :  { %v248_v19 = vmax.f32 %v239_v18, 0.0 }
 0x219   :  { %252 = vst [vmem:[%s459_s6 + $0x8] sm:$0xff] %v248_v19 }
 0x21c   :  { %v241_v20 = vpop.f32.mrf.mxu2 }
 0x21d   :  { %v242_v21 = vadd.f32 %v295_v13, %v241_v20 }
 0x21f   :  { %v249_v22 = vmax.f32 %v242_v21, 0.0 }
 0x221   :  { %253 = vst [vmem:[%s459_s6 + $0x10] sm:$0xff] %v249_v22 }
 0x224   :  { %v244_v23 = vpop.f32.mrf.mxu2 }
 0x225   :  { %v245_v24 = vadd.f32 %v295_v13, %v244_v23 }
 0x227   :  { %v250_v25 = vmax.f32 %v245_v24, 0.0 }
 0x229   :  { %254 = vst [vmem:[%s459_s6 + $0x18] sm:$0xff] %v250_v25 }
 0x22a   :  { %259 = vsyncpa [#allocation3], 1 }
 0x22b   :  { %260 = vsyncpa [#allocation5], 1 }

</bundles_post_ra>
